<compile_context>
chip_gen: v5e
topology: v5e:2x2
jax: 0.10.0
libtpu: 0.0.40
codegen_flags: <defaults>
</compile_context>

<pallas_src>
import jax
import jax.numpy as jnp
from jax.experimental import pallas as pl
from jax.experimental.pallas import tpu as pltpu


def _round_up(x: int, m: int) -> int:
    return ((x + m - 1) // m) * m


def _tile_sizes(n: int, tm: int, tk: int):
    """Clamp row / contraction tiles to the (padded) problem size.

    bf16 sublane packing is (16, 128): keep the adj row tile a multiple of 16 and
    the contraction tile a multiple of 128 (adj lane dim / P sublane dim).
    """
    tm = min(tm, _round_up(n, 16))
    tk = min(tk, _round_up(n, 128))
    # Keep at least 2 row tiles whenever possible so the "parallel" row axis can
    # feed both TensorCores on megacore / v7x parts.
    if _round_up(n, tm) // tm < 2 and n > 16:
        tm = max(16, _round_up((n + 1) // 2, 16))
    n_rows = _round_up(n, tm)
    n_k = _round_up(n, tk)
    return tm, tk, n_rows, n_k


def _vmem_limit_bytes() -> int:
    """~3/4 of physical VMEM, capped at 96 MiB (96 MiB on v5e/v6e, 48 MiB on v7x)."""
    cap = 64 * 1024 * 1024
    try:
        cap = int(pltpu.get_tpu_info().vmem_capacity_bytes)
    except Exception:
        pass
    return int(min(96 * 1024 * 1024, cap * 3 // 4))


def prepare_adjacency(adj, *, tm=512, tk=1024, compute_dtype=jnp.bfloat16):
    """Pad + cast the (N, N) adjacency once; reuse the result across layers/steps.

    Must be built with the same tm / tk / compute_dtype that gcn_layer will use.
    """
    n = adj.shape[0]
    assert adj.shape == (n, n)
    _, _, n_rows, n_k = _tile_sizes(n, tm, tk)
    return jnp.zeros((n_rows, n_k), compute_dtype).at[:n, :n].set(
        adj.astype(compute_dtype))


def _make_aggregate_kernel(p_resident: bool, tk: int):
    """out[i] = bias + sum_k adj[i, k] @ P[k], accumulated in f32 in out_ref."""

    def kernel(adj_ref, p_ref, b_ref, out_ref):
        k = pl.program_id(1)

        if p_resident:
            start = pl.multiple_of(k * tk, tk)
            p_blk = p_ref[pl.ds(start, tk), :]
        else:
            p_blk = p_ref[...]

        @pl.when(k == 0)
        def _():
            # Seed the VMEM-resident f32 output tile with the broadcast bias so the
            # contraction accumulates straight into out_ref (no scratch copy).
            out_ref[...] = jnp.broadcast_to(b_ref[...], out_ref.shape)

        out_ref[...] += jnp.dot(adj_ref[...], p_blk,
                                preferred_element_type=jnp.float32)

    return kernel


def gcn_layer(adj, features, weight, bias, *, tm=512, tk=1024,
              compute_dtype=jnp.bfloat16, p_resident=None):
    """GCNLayer forward: Linear(adj @ features) == adj @ (features @ W^T) + b.

    adj:      [N, N] float32  OR the output of prepare_adjacency() (amortized cast)
    features: [N, Fin] float32
    weight:   [Fout, Fin]     (PyTorch nn.Linear layout)
    bias:     [Fout]
    returns:  [N, Fout] float32
    """
    N, Fin = features.shape
    Fout = weight.shape[0]
    assert weight.shape == (Fout, Fin) and bias.shape == (Fout,)

    tm, tk, n_rows, n_k = _tile_sizes(N, tm, tk)
    fout_p = _round_up(Fout, 128)          # lane-dense output / P columns
    vmem_limit = _vmem_limit_bytes()

    # ---- adjacency: use the pre-prepared padded compute-dtype array if given ----
    if adj.shape == (n_rows, n_k) and adj.dtype == compute_dtype:
        adj_p = adj
    else:
        assert adj.shape == (N, N), (
            "adj must be the raw (N, N) matrix or prepare_adjacency() output built "
            "with the same tm/tk/compute_dtype")
        adj_p = jnp.zeros((n_rows, n_k), compute_dtype).at[:N, :N].set(
            adj.astype(compute_dtype))

    # ---- projection P = X @ W^T (O(N*Fin*Fout), negligible) in plain XLA --------
    proj = jnp.dot(features, weight.T, preferred_element_type=jnp.float32)
    p_p = jnp.zeros((n_k, fout_p), compute_dtype).at[:N, :Fout].set(
        proj.astype(compute_dtype))
    b_p = jnp.zeros((1, fout_p), jnp.float32).at[0, :Fout].set(
        bias.astype(jnp.float32))

    # ---- keep P VMEM-resident (single DMA) when it comfortably fits -------------
    itemsize = jnp.dtype(compute_dtype).itemsize
    if p_resident is None:
        need = (2 * n_k * fout_p * itemsize     # P (assume double-buffered)
                + 2 * tm * tk * itemsize        # adj double buffer
                + 2 * tm * fout_p * 4)          # out double buffer (f32)
        p_resident = need < vmem_limit // 2

    if p_resident:
        p_spec = pl.BlockSpec((n_k, fout_p), lambda i, k: (0, 0))   # DMA'd once
    else:
        p_spec = pl.BlockSpec((tk, fout_p), lambda i, k: (k, 0))    # streamed per k

    # NOTE: if the adj DMA is still exposed on v5e (lowest HBM BW), the adj spec is
    # the place to try pipeline_mode=pl.Buffered(3); left at the default depth here.
    out_p = pl.pallas_call(
        _make_aggregate_kernel(p_resident, tk),
        out_shape=jax.ShapeDtypeStruct((n_rows, fout_p), jnp.float32),
        grid_spec=pltpu.PrefetchScalarGridSpec(
            num_scalar_prefetch=0,
            grid=(n_rows // tm, n_k // tk),
            in_specs=[
                pl.BlockSpec((tm, tk), lambda i, k: (i, k)),       # adj tile (~1 MiB)
                p_spec,                                            # projected features
                pl.BlockSpec((1, fout_p), lambda i, k: (0, 0)),    # bias (resident)
            ],
            out_specs=pl.BlockSpec((tm, fout_p), lambda i, k: (i, 0)),
        ),
        compiler_params=pltpu.CompilerParams(
            dimension_semantics=("parallel", "arbitrary"),
            vmem_limit_bytes=vmem_limit),
    )(adj_p, p_p, b_p)

    return out_p[:N, :Fout]


if __name__ == "__main__":
    # Small shapes: N nodes = 256, in_features = 64, out_features = 32
    N, Fin, Fout = 256, 64, 32

    key = jax.random.PRNGKey(0)
    k_adj, k_feat, k_w, k_b = jax.random.split(key, 4)

    adj = jax.random.uniform(k_adj, (N, N), dtype=jnp.float32)
    features = jax.random.normal(k_feat, (N, Fin), dtype=jnp.float32)

    # Deterministic nn.Linear-style init: U(-1/sqrt(Fin), 1/sqrt(Fin))
    bound = 1.0 / (Fin ** 0.5)
    weight = jax.random.uniform(k_w, (Fout, Fin), dtype=jnp.float32,
                                minval=-bound, maxval=bound)
    bias = jax.random.uniform(k_b, (Fout,), dtype=jnp.float32,
                              minval=-bound, maxval=bound)

    # Reference (plain fp32 JAX); bf16 MXU inputs => loose-ish tolerance.
    ref = jnp.dot(jnp.dot(adj, features), weight.T) + bias
    scale = float(jnp.max(jnp.abs(ref)))

    # Pad + cast the adjacency once (amortized across layers / steps in real use).
    adj_prepped = prepare_adjacency(adj)

    # Main run: large-tile defaults (clamped to N), VMEM-resident P, prepped adj.
    out = gcn_layer(adj_prepped, features, weight, bias)
    out = jax.block_until_ready(out)
    assert out.shape == (N, Fout)
    max_err = float(jnp.max(jnp.abs(out - ref)))
    assert max_err <= 3e-2 * scale + 1e-3, (max_err, scale)

    # Coverage run: small tiles + streamed-P fallback purely to exercise the multi-k
    # accumulation path and the raw-adj prep path (production keeps the defaults).
    out2 = gcn_layer(adj, features, weight, bias, tm=128, tk=128, p_resident=False)
    out2 = jax.block_until_ready(out2)
    max_err2 = float(jnp.max(jnp.abs(out2 - ref)))
    assert max_err2 <= 3e-2 * scale + 1e-3, (max_err2, scale)

    print("KERNEL_OK")
</pallas_src>

<mosaic_0001>
module attributes {stable_mosaic.version = 11 : i64} {
  func.func @kernel(%arg0: i32, %arg1: i32, %arg2: memref<128x256xbf16, #tpu.memory_space<vmem>>, %arg3: memref<256x128xbf16, #tpu.memory_space<vmem>>, %arg4: memref<1x128xf32, #tpu.memory_space<vmem>>, %arg5: memref<128x128xf32, #tpu.memory_space<vmem>>) attributes {dimension_semantics = [#tpu.dimension_semantics<parallel>, #tpu.dimension_semantics<arbitrary>], iteration_bounds = array<i64: 2, 1>, scalar_prefetch = 0 : i64, scratch_operands = 0 : i64, tpu.core_type = #tpu.core_type<tc>, window_params = [{transform_indices = @transform_0, window_bounds = array<i64: 128, 256>}, {pipeline_mode = #tpu.pipeline_mode<synchronous>, transform_indices = @transform_1, window_bounds = array<i64: 256, 128>}, {pipeline_mode = #tpu.pipeline_mode<synchronous>, transform_indices = @transform_2, window_bounds = array<i64: 1, 128>}, {transform_indices = @transform_3, window_bounds = array<i64: 128, 128>}]} {
    %c256_i32 = arith.constant 256 : i32
    %0 = arith.muli %arg1, %c256_i32 : i32
    %1 = tpu.assume_multiple %0, 256 : i32
    %2 = arith.index_cast %1 : i32 to index
    %c0 = arith.constant 0 : index
    %3 = vector.load %arg3[%2, %c0] : memref<256x128xbf16, #tpu.memory_space<vmem>>, vector<256x128xbf16>
    %c0_i32 = arith.constant 0 : i32
    %4 = arith.cmpi eq, %arg1, %c0_i32 : i32
    %5 = arith.extui %4 : i1 to i32
    %c0_i32_0 = arith.constant 0 : i32
    %6 = arith.cmpi ne, %5, %c0_i32_0 : i32
    scf.if %6 {
      %c0_7 = arith.constant 0 : index
      %c0_8 = arith.constant 0 : index
      %12 = vector.load %arg4[%c0_7, %c0_8] : memref<1x128xf32, #tpu.memory_space<vmem>>, vector<1x128xf32>
      %13 = vector.shape_cast %12 : vector<1x128xf32> to vector<1x128xf32>
      %14 = vector.broadcast %13 : vector<1x128xf32> to vector<128x128xf32>
      %c0_9 = arith.constant 0 : index
      %c0_10 = arith.constant 0 : index
      %15 = vector.load %arg5[%c0_9, %c0_10] : memref<128x128xf32, #tpu.memory_space<vmem>>, vector<128x128xf32>
      tpu.vector_store %arg5[%c0_9, %c0_10], %14 {strides = array<i32>} : memref<128x128xf32, #tpu.memory_space<vmem>>, vector<128x128xf32>,
    } else {
    }
    %c0_1 = arith.constant 0 : index
    %c0_2 = arith.constant 0 : index
    %7 = vector.load %arg5[%c0_1, %c0_2] : memref<128x128xf32, #tpu.memory_space<vmem>>, vector<128x128xf32>
    %c0_3 = arith.constant 0 : index
    %c0_4 = arith.constant 0 : index
    %8 = vector.load %arg2[%c0_3, %c0_4] : memref<128x256xbf16, #tpu.memory_space<vmem>>, vector<128x256xbf16>
    %cst = arith.constant dense<0.000000e+00> : vector<128x128xf32>
    %9 = tpu.matmul %8, %3, %cst {dimension_numbers = #tpu.dot_dimension_numbers<[1], [0], [0], [1], [0, 0, 1, 1], [], []>} : vector<128x256xbf16>, vector<256x128xbf16>, vector<128x128xf32> -> vector<128x128xf32>
    %10 = arith.addf %7, %9 : vector<128x128xf32>
    %c0_5 = arith.constant 0 : index
    %c0_6 = arith.constant 0 : index
    %11 = vector.load %arg5[%c0_5, %c0_6] : memref<128x128xf32, #tpu.memory_space<vmem>>, vector<128x128xf32>
    tpu.vector_store %arg5[%c0_5, %c0_6], %10 {strides = array<i32>} : memref<128x128xf32, #tpu.memory_space<vmem>>, vector<128x128xf32>,
    return
  }
  func.func @transform_0(%arg0: i32, %arg1: i32) -> (i32, i32) {
    %c0_i32 = arith.constant 0 : i32
    return %arg0, %arg1 : i32, i32
  }
  func.func @transform_1(%arg0: i32, %arg1: i32) -> (i32, i32) {
    %c0_i32 = arith.constant 0 : i32
    %c0_i32_0 = arith.constant 0 : i32
    %c0_i32_1 = arith.constant 0 : i32
    return %c0_i32, %c0_i32_0 : i32, i32
  }
  func.func @transform_2(%arg0: i32, %arg1: i32) -> (i32, i32) {
    %c0_i32 = arith.constant 0 : i32
    %c0_i32_0 = arith.constant 0 : i32
    %c0_i32_1 = arith.constant 0 : i32
    return %c0_i32, %c0_i32_0 : i32, i32
  }
  func.func @transform_3(%arg0: i32, %arg1: i32) -> (i32, i32) {
    %c0_i32 = arith.constant 0 : i32
    %c0_i32_0 = arith.constant 0 : i32
    return %arg0, %c0_i32 : i32, i32
  }
}

</mosaic_0001>

<bundles_post_ra>
// kernel: tpu_custom_call.1
= control target key start
LH: loop header
LB: loop body
LE: loop exit
PB: predicated region body
PF: predicated region fallthrough
CT: control target
= control target key end

     0   :  { %s1418_s0 = inlined_call_operand.hbm [shape: bf16[256,256], index: 0, kind: input, shape index: {}]   ;;  %s1419_s1 = inlined_call_operand.hbm [shape: bf16[256,128], index: 1, kind: input, shape index: {}]   ;;  %s1420_s2 = inlined_call_operand.vmem [shape: f32[1,128], index: 2, kind: input, shape index: {}]   ;;  %s1421_s3 = inlined_call_operand.hbm [shape: f32[256,128], index: 3, kind: output, shape index: {}]  }
   0x1   :  { %1422 = sst [smem:[#allocation11_spill]] %s1419_s1 }
   0x2   :  { %8 = vsyncpa [#allocation3], 0 }
   0x3   :  { %10 = vsyncpa [#allocation3 + $0x1], 0 }
   0x4   :  { %11 = vsyncpa [#allocation6], 0 }
   0x5   :  { %12 = vsyncpa [#allocation4], 0 }
   0x6   :  { %14 = vsyncpa [#allocation4 + $0x1], 0  ;;  %s1191_s12 = smov 0   ;;  %s1193_s13 = smov 0  }
   0x7   :  { %s1195_s14 = smov 0   ;;  %s1197_s15 = smov 0  }
   0x8   :  { %s1199_s16 = smov 0   ;;  %s1201_s17 = smov 0  }
   0x9 LB: > { %s739_s18 = sadd.s32 4294967295, %s1162_s17   ;;  %s740_s19 = sadd.s32 4294967294, %s1162_s17   ;;  %s1162_s17 = sphi %s1201_s17, %s20_s17   ;;  %s1158_s16 = sphi %s1199_s16, %s1435_s16   ;;  %s1154_s15 = sphi %s1197_s15, %s1434_s15   ;;  %s1150_s14 = sphi %s1195_s14, %s1433_s14   ;;  %s1146_s13 = sphi %s1193_s13, %s1432_s13   ;;  %s1142_s12 = sphi %s1191_s12, %s1431_s12  }
   0xa   : > { %p54_p0 = scmp.ne.s32.totalorder %s1146_s13, %s1142_s12  ;;  %p1225_p1 = scmp.eq.s32.totalorder %s739_s18, 0 }
   0xb   : > { %p1229_p2 = scmp.eq.s32.totalorder %s739_s18, 1  ;;  %p126_p3 = scmp.eq.s32.totalorder %s740_s19, 1 }
   0xc   : > { %p1235_p4 = por %p1225_p1, %p54_p0  ;;  %p741_p5 = scmp.ge.s32.totalorder %s1162_s17, 1 }
   0xd   : > { %p1240_p6 = por %p126_p3, %p54_p0  ;;  %p133_p7 = scmp.lt.s32.totalorder %s1162_s17, 3 }
   0xe   : > { %s1427_s1 = sld [smem:[#allocation11_spill]]  ;;  %s1164_s28 = smov [#allocation5]  }
   0xf   : > { %p1248_p8 = pnand %p741_p5, %p133_p7  ;;  %s146_s29 = sshll.u32 %s1164_s28, 4  ;;  %s147_s29 = int_to_ptr.vmem [resolvable:$true] %s146_s29 }
  0x10   : > { %p743_p11 = scmp.ge.s32.totalorder %s1162_s17, 2  ;;  %s1165_s30 = smov 64  }
  0x11   : > { %p944_p9 = pneg %p1248_p8  ;;  %s1166_s4 = smov 4  }
  0x12   : > { %s32_s5 = sadd.s32 1, %s1158_s16  ;;  %s41_s6 = sadd.s32 1, %s1150_s14 }
  0x13   : > { %p945_p10 = pnand %p944_p9, %p1225_p1  ;;  %p34_p12 = scmp.ge.s32.totalorder %s32_s5, 2 }
  0x14   : > { %s144_s26 = sshll.u32 %s1427_s1, 4  ;;  %p48_p13 = scmp.ne.s32.totalorder %s1150_s14, %s1146_s13  ;;  %s145_s26 = int_to_ptr.hbm [resolvable:$true] %s144_s26 }
  0x15   : > { %947 = dma.hbm_to_vmem [thread:$0]  (!%p945_p10), %s145_s26, 2048, %s147_s29, [#allocation6], %s1165_s30, %s1165_s30, %s1166_s4  }
  0x16   : > { %p49_p0 = scmp.eq.s32.totalorder %s1162_s17, 0  ;;  %s1437_s5 = smov (%p34_p12, %s32_s5), 0 }
  0x17   : > { %p1270_p5 = por %p1229_p2, %p48_p13  ;;  %s36_s9 = ssub.s32 %s1158_s16, %s1437_s5 }
  0x18   : > { %p1264_p3 = por %p49_p0, %p48_p13  ;;  %p957_p7 = scmp.lt.s32.totalorder %s1162_s17, 2 }
  0x19   : > { %p39_p9 = scmp.eq.s32.totalorder %s36_s9, 0  ;;  %s163_s10 = sand.u32 1, %s1150_s14  }
  0x1a   : > { %s744_s11 = sshll.u32 %s163_s10, 7  ;;  %s886_s19 = sshll.u32 %s1158_s16, 7 }
  0x1b   : > { %s1279_s18 = scalar_select %p39_p9, %s1150_s14, %s41_s6  }
  0x1c   : > { %s175_s26 = scalar_lea.hbm %s1418_s0, %s886_s19  ;;  %s167_s28 = scalar_lea.vmem [#allocation2], %s744_s11 }
  0x1d   : > { %s178_s29 = sshll.u32 %s167_s28, 4  ;;  %s176_s21 = sshll.u32 %s175_s26, 4  ;;  %s179_s29 = int_to_ptr.vmem [resolvable:$true] %s178_s29  ;;  %s177_s21 = int_to_ptr.hbm [resolvable:$true] %s176_s21 }
  0x1e   : > { %p949_p2 = pnand %p957_p7, %p1264_p3  ;;  %s164_s30 = scalar_lea.sflag [#allocation3], %s163_s10 }
  0x1f   : > { %s1167_s4 = smov 128   ;;  %s1168_s1 = smov 8  }
  0x20   : > { %951 = dma.hbm_to_vmem [thread:$0]  (!%p949_p2), %s177_s21, 2048, %s179_s29, %s164_s30, %s1167_s4, %s1167_s4, %s1168_s1  }
  0x21   : > { %190 = sbr.rel (%p1248_p8) target bundleno = 270 (0x10e), region = 32  ;;  %s1290_s6 = sand.u32 (!%p1248_p8), 1, %s1146_s13  }
  0x22   : > { %s749_s9 = sshll.u32 (!%p1248_p8), %s1290_s6, 7  ;;  %s193_s11 = scalar_lea.sflag (!%p1248_p8), [#allocation3], %s1290_s6 }
  0x23   : > { %s1296_s19 = scalar_lea.vmem (!%p1248_p8), [#allocation2], %s749_s9 }
  0x26   : > { %1129 = dma.done.wait (%p1235_p4), %s193_s11, 2048  }
  0x27   : > { %1131 = vsyncadd (%p1235_p4), %s193_s11, 4294965248 }
  0x28   : > { %1133 = dma.done.wait (%p1225_p1), [#allocation6], 2048  }
  0x29   : > { %1135 = vsyncadd (%p1225_p1), [#allocation6], 4294965248  ;;  %v894_v0 = vld [vmem:[#allocation5 + $0x38] sm:$0xff]  ;;  %v893_v2 = vld [vmem:[#allocation5 + $0x30] sm:$0xff]  ;;  %s1346_s22 = scalar_lea.vmem [#allocation7], %s749_s9  ;;  %s919_s27 = sshll.u32 %s1154_s15, 7 }
  0x2a   : > { %v902_v1 = vld [vmem:[#allocation5 + $0x78] sm:$0xff]  ;;  %497 = vmatpush.bf16.msra.mxu0 %v894_v0  ;;  %920 = vmatpush.bf16.msra.mxu2 %v894_v0  ;;  %v901_v3 = vld [vmem:[#allocation5 + $0x70] sm:$0xff]  ;;  %v892_v4 = vld [vmem:[#allocation5 + $0x28] sm:$0xff]  ;;  %s639_s24 = scalar_lea.hbm %s1421_s3, %s919_s27  ;;  %s640_s25 = sshll.u32 %s1346_s22, 4  ;;  %s641_s25 = int_to_ptr.vmem [resolvable:$true] %s640_s25 }
  0x2b   : > { %546 = vmatpush.bf16.msra.mxu1 %v902_v1  ;;  %928 = vmatpush.bf16.msra.mxu3 %v902_v1  ;;  %v900_v5 = vld [vmem:[#allocation5 + $0x68] sm:$0xff]  ;;  %v891_v6 = vld [vmem:[#allocation5 + $0x20] sm:$0xff]  ;;  %v890_v8 = vld [vmem:[#allocation5 + $0x18] sm:$0xff]  ;;  %s642_s26 = sshll.u32 %s639_s24, 4  ;;  %s628_s15 = scalar_lea.sflag [#allocation4], %s1290_s6  ;;  %s643_s26 = int_to_ptr.hbm [resolvable:$true] %s642_s26 }
  0x2c   : > { %v899_v7 = vld [vmem:[#allocation5 + $0x60] sm:$0xff]  ;;  %v898_v9 = vld [vmem:[#allocation5 + $0x58] sm:$0xff]  ;;  %v889_v10 = vld [vmem:[#allocation5 + $0x10] sm:$0xff]  ;;  %s1090_s28 = sshra.s32 %s643_s26, 4  ;;  %s1096_s4 = scalar_lea.hbm %s1421_s3, 256  ;;  %s1091_s28 = int_to_ptr.hbm [resolvable:$true] %s1090_s28 }
  0x2d   : > { %v897_v11 = vld [vmem:[#allocation5 + $0x50] sm:$0xff]  ;;  %v888_v12 = vld [vmem:[#allocation5 + $0x8] sm:$0xff]  ;;  %v887_v14 = vld [vmem:[#allocation5] sm:$0xff]  ;;  %s1092_s29 = scalar_lea.hbm %s1091_s28, 128  ;;  %p1097_p10 = scmp.lt.s32.totalorder %s1091_s28, %s1421_s3 }
  0x2e   : > { %498 = vmatpush.bf16.msra.mxu0 %v893_v2  ;;  %921 = vmatpush.bf16.msra.mxu2 %v893_v2  ;;  %v896_v13 = vld [vmem:[#allocation5 + $0x48] sm:$0xff]  ;;  %v895_v15 = vld [vmem:[#allocation5 + $0x40] sm:$0xff]  ;;  %v762_v28 = vld [vmem:[%s1296_s19 + $0x10] sm:$0xf]  ;;  %p1093_p1 = scmp.ne.s32.totalorder %s1091_s28, %s1092_s29  ;;  %p1098_p12 = scmp.lt.s32.totalorder %s1096_s4, %s1092_s29 }
  0x2f   : > { %547 = vmatpush.bf16.msra.mxu1 %v901_v3  ;;  %929 = vmatpush.bf16.msra.mxu3 %v901_v3  ;;  %v754_v16 = vld [vmem:[%s1296_s19] sm:$0xf]  ;;  %v904_v17 = vld [vmem:[%s1296_s19 + $0x4] sm:$0xf0]  ;;  %v903_v20 = vld [vmem:[%s1296_s19 + $0x4] sm:$0xf] }
  0x30   : > { %v786_v18 = vld [vmem:[%s1296_s19 + $0x40] sm:$0xf]  ;;  %v912_v19 = vld [vmem:[%s1296_s19 + $0x44] sm:$0xf0]  ;;  %v756_v21 = vld [vmem:[%s1296_s19 + $0x8] sm:$0xf0]  ;;  %v755_v24 = vor.u32 %v904_v17, %v754_v16  ;;  %p1094_p4 = pnand %p1093_p1, %p1270_p5  ;;  %p1099_p13 = por %p1098_p12, %p1097_p10 }
  0x31   : > { %v911_v22 = vld [vmem:[%s1296_s19 + $0x44] sm:$0xf]  ;;  %v788_v23 = vld [vmem:[%s1296_s19 + $0x48] sm:$0xf0]  ;;  %v787_v25 = vor.u32 %v912_v19, %v786_v18  ;;  %v759_v26 = vor.u32 %v903_v20, %v756_v21  ;;  %v906_v29 = vld [vmem:[%s1296_s19 + $0x14] sm:$0xf0] }
  0x32   : > { %499 = vmatpush.bf16.msra.mxu0 %v892_v4  ;;  %922 = vmatpush.bf16.msra.mxu2 %v892_v4  ;;  %v791_v27 = vor.u32 %v911_v22, %v788_v23  ;;  %v794_v30 = vld [vmem:[%s1296_s19 + $0x50] sm:$0xf]  ;;  %v914_v31 = vld [vmem:[%s1296_s19 + $0x54] sm:$0xf0]  ;;  %v905_v32 = vld [vmem:[%s1296_s19 + $0x14] sm:$0xf]  ;;  %v763_v36 = vor.u32 %v906_v29, %v762_v28  ;;  %p1095_p8 = pneg %p1094_p4 }
  0x33   : > { %548 = vmatpush.bf16.msra.mxu1 %v900_v5  ;;  %930 = vmatpush.bf16.msra.mxu3 %v900_v5  ;;  %v764_v33 = vld [vmem:[%s1296_s19 + $0x18] sm:$0xf0]  ;;  %v913_v34 = vld [vmem:[%s1296_s19 + $0x54] sm:$0xf]  ;;  %v795_v37 = vor.u32 %v914_v31, %v794_v30  ;;  %v770_v40 = vld [vmem:[%s1296_s19 + $0x20] sm:$0xf] }
  0x34   : > { %v796_v35 = vld [vmem:[%s1296_s19 + $0x58] sm:$0xf0]  ;;  %v767_v38 = vor.u32 %v905_v32, %v764_v33  ;;  %v908_v41 = vld [vmem:[%s1296_s19 + $0x24] sm:$0xf0]  ;;  %v802_v42 = vld [vmem:[%s1296_s19 + $0x60] sm:$0xf]  ;;  %p1100_p0 = pnand %p1099_p13, %p1095_p8 }
  0x35   : > { %v799_v39 = vor.u32 %v913_v34, %v796_v35  ;;  %v916_v43 = vld [vmem:[%s1296_s19 + $0x64] sm:$0xf0]  ;;  %v907_v44 = vld [vmem:[%s1296_s19 + $0x24] sm:$0xf]  ;;  %v772_v45 = vld [vmem:[%s1296_s19 + $0x28] sm:$0xf0]  ;;  %v771_v48 = vor.u32 %v908_v41, %v770_v40 }
  0x36   : > { %500 = vmatpush.bf16.msra.mxu0 %v891_v6  ;;  %923 = vmatpush.bf16.msra.mxu2 %v891_v6  ;;  %v915_v46 = vld [vmem:[%s1296_s19 + $0x64] sm:$0xf]  ;;  %v804_v47 = vld [vmem:[%s1296_s19 + $0x68] sm:$0xf0]  ;;  %v803_v49 = vor.u32 %v916_v43, %v802_v42  ;;  %v775_v50 = vor.u32 %v907_v44, %v772_v45  ;;  %v778_v52 = vld [vmem:[%s1296_s19 + $0x30] sm:$0xf] }
  0x37   : > { %549 = vmatpush.bf16.msra.mxu1 %v899_v7  ;;  %931 = vmatpush.bf16.msra.mxu3 %v899_v7  ;;  %v807_v51 = vor.u32 %v915_v46, %v804_v47  ;;  %v910_v53 = vld [vmem:[%s1296_s19 + $0x34] sm:$0xf0]  ;;  %v810_v54 = vld [vmem:[%s1296_s19 + $0x70] sm:$0xf]  ;;  %v909_v56 = vld [vmem:[%s1296_s19 + $0x34] sm:$0xf] }
  0x38   : > { %v918_v55 = vld [vmem:[%s1296_s19 + $0x74] sm:$0xf0]  ;;  %v780_v57 = vld [vmem:[%s1296_s19 + $0x38] sm:$0xf0]  ;;  %v917_v58 = vld [vmem:[%s1296_s19 + $0x74] sm:$0xf]  ;;  %v779_v60 = vor.u32 %v910_v53, %v778_v52 }
  0x39   : > { %v812_v59 = vld [vmem:[%s1296_s19 + $0x78] sm:$0xf0]  ;;  %v811_v61 = vor.u32 %v918_v55, %v810_v54  ;;  %v783_v62 = vor.u32 %v909_v56, %v780_v57  ;;  %v1341_v1 = vld [vmem:[%s1420_s2] ss:$0 sm:$0xff] }
  0x3a   : > { %501 = vmatpush.bf16.msra.mxu0 %v890_v8  ;;  %924 = vmatpush.bf16.msra.mxu2 %v890_v8  ;;  %v815_v63 = vor.u32 %v917_v58, %v812_v59 }
  0x3b   : > { %550 = vmatpush.bf16.msra.mxu1 %v898_v9  ;;  %932 = vmatpush.bf16.msra.mxu3 %v898_v9 }
  0x3e   : > { %502 = vmatpush.bf16.msra.mxu0 %v889_v10  ;;  %925 = vmatpush.bf16.msra.mxu2 %v889_v10 }
  0x3f   : > { %551 = vmatpush.bf16.msra.mxu1 %v897_v11  ;;  %933 = vmatpush.bf16.msra.mxu3 %v897_v11 }
  0x42   : > { %503 = vmatpush.bf16.msra.mxu0 %v888_v12  ;;  %926 = vmatpush.bf16.msra.mxu2 %v888_v12 }
  0x43   : > { %552 = vmatpush.bf16.msra.mxu1 %v896_v13  ;;  %934 = vmatpush.bf16.msra.mxu3 %v896_v13 }
  0x46   : > { %504 = vmatpush.bf16.msra.mxu0 %v887_v14  ;;  %927 = vmatpush.bf16.msra.mxu2 %v887_v14 }
  0x47   : > { %553 = vmatpush.bf16.msra.mxu1 %v895_v15  ;;  %935 = vmatpush.bf16.msra.mxu3 %v895_v15 }
  0x49   : > { %505 = vmatmul.bf16.vlgmr.msra.gmra.mxu0 %v755_v24  ;;  %525 = vmatmul.bf16.vlgmr.msra.gmra.mxu2 %v787_v25 }
  0x4a   : > { %554 = vmatmul.bf16.vlgmr.msra.gmra.mxu1 %v759_v26  ;;  %574 = vmatmul.bf16.vlgmr.msra.gmra.mxu3 %v791_v27 }
  0x59   : > { %510 = vmatmul.bf16.gmra.mxu0 %v763_v36  ;;  %530 = vmatmul.bf16.gmra.mxu2 %v795_v37 }
  0x5a   : > { %559 = vmatmul.bf16.gmra.mxu1 %v767_v38  ;;  %579 = vmatmul.bf16.gmra.mxu3 %v799_v39 }
  0x69   : > { %515 = vmatmul.bf16.gmra.mxu0 %v771_v48  ;;  %535 = vmatmul.bf16.gmra.mxu2 %v803_v49 }
  0x6a   : > { %564 = vmatmul.bf16.gmra.mxu1 %v775_v50  ;;  %584 = vmatmul.bf16.gmra.mxu3 %v807_v51 }
  0x79   : > { %520 = vmatmul.bf16.gmra.mxu0 %v779_v60  ;;  %540 = vmatmul.bf16.gmra.mxu2 %v811_v61 }
  0x7a   : > { %569 = vmatmul.bf16.gmra.mxu1 %v783_v62  ;;  %589 = vmatmul.bf16.gmra.mxu3 %v815_v63 }
  0xc6   : > { %v506_v0 = vpop.f32.mrf.mxu0 }
  0xc7   : > { %v555_v2 = vpop.f32.mrf.mxu1 }
  0xc8   : > { %v556_v3 = vadd.f32 %v555_v2, %v506_v0 }
  0xca   : > { %v595_v4 = vadd.f32 %v1341_v1, %v556_v3 }
  0xcc   : > { %611 = vst [vmem:[%s1346_s22] sm:$0xff] %v595_v4  ;;  %v526_v5 = vpop.f32.mrf.mxu2 }
  0xcd   : > { %v575_v6 = vpop.f32.mrf.mxu3 }
  0xce   : > { %v576_v7 = vadd.f32 %v575_v6, %v526_v5  ;;  %v508_v8 = vpop.f32.mrf.mxu0 }
  0xcf   : > { %v557_v9 = vpop.f32.mrf.mxu1 }
  0xd0   : > { %v603_v10 = vadd.f32 %v1341_v1, %v576_v7  ;;  %v558_v11 = vadd.f32 %v557_v9, %v508_v8 }
  0xd2   : > { %619 = vst [vmem:[%s1346_s22 + $0x40] sm:$0xff] %v603_v10  ;;  %v596_v12 = vadd.f32 %v1341_v1, %v558_v11 }
  0xd4   : > { %612 = vst [vmem:[%s1346_s22 + $0x8] sm:$0xff] %v596_v12  ;;  %v528_v13 = vpop.f32.mrf.mxu2 }
  0xd5   : > { %v577_v14 = vpop.f32.mrf.mxu3 }
  0xd6   : > { %v578_v15 = vadd.f32 %v577_v14, %v528_v13  ;;  %v511_v16 = vpop.f32.mrf.mxu0 }
  0xd7   : > { %v560_v17 = vpop.f32.mrf.mxu1 }
  0xd8   : > { %v604_v18 = vadd.f32 %v1341_v1, %v578_v15  ;;  %v561_v19 = vadd.f32 %v560_v17, %v511_v16 }
  0xda   : > { %620 = vst [vmem:[%s1346_s22 + $0x48] sm:$0xff] %v604_v18  ;;  %v597_v20 = vadd.f32 %v1341_v1, %v561_v19 }
  0xdc   : > { %613 = vst [vmem:[%s1346_s22 + $0x10] sm:$0xff] %v597_v20  ;;  %v531_v21 = vpop.f32.mrf.mxu2 }
  0xdd   : > { %v580_v22 = vpop.f32.mrf.mxu3 }
  0xde   : > { %v581_v23 = vadd.f32 %v580_v22, %v531_v21  ;;  %v513_v24 = vpop.f32.mrf.mxu0 }
  0xdf   : > { %v562_v25 = vpop.f32.mrf.mxu1 }
  0xe0   : > { %v605_v26 = vadd.f32 %v1341_v1, %v581_v23  ;;  %v563_v27 = vadd.f32 %v562_v25, %v513_v24 }
  0xe2   : > { %621 = vst [vmem:[%s1346_s22 + $0x50] sm:$0xff] %v605_v26  ;;  %v598_v28 = vadd.f32 %v1341_v1, %v563_v27 }
  0xe4   : > { %614 = vst [vmem:[%s1346_s22 + $0x18] sm:$0xff] %v598_v28  ;;  %v533_v29 = vpop.f32.mrf.mxu2 }
  0xe5   : > { %v582_v30 = vpop.f32.mrf.mxu3 }
  0xe6   : > { %v583_v31 = vadd.f32 %v582_v30, %v533_v29  ;;  %v516_v32 = vpop.f32.mrf.mxu0 }
  0xe7   : > { %v565_v33 = vpop.f32.mrf.mxu1 }
  0xe8   : > { %v606_v34 = vadd.f32 %v1341_v1, %v583_v31  ;;  %v566_v35 = vadd.f32 %v565_v33, %v516_v32 }
  0xea   : > { %622 = vst [vmem:[%s1346_s22 + $0x58] sm:$0xff] %v606_v34  ;;  %v599_v36 = vadd.f32 %v1341_v1, %v566_v35 }
  0xec   : > { %615 = vst [vmem:[%s1346_s22 + $0x20] sm:$0xff] %v599_v36  ;;  %v536_v37 = vpop.f32.mrf.mxu2 }
  0xed   : > { %v585_v38 = vpop.f32.mrf.mxu3 }
  0xee   : > { %v586_v39 = vadd.f32 %v585_v38, %v536_v37  ;;  %v518_v40 = vpop.f32.mrf.mxu0 }
  0xef   : > { %v567_v41 = vpop.f32.mrf.mxu1 }
  0xf0   : > { %v607_v42 = vadd.f32 %v1341_v1, %v586_v39  ;;  %v568_v43 = vadd.f32 %v567_v41, %v518_v40 }
  0xf2   : > { %623 = vst [vmem:[%s1346_s22 + $0x60] sm:$0xff] %v607_v42  ;;  %v600_v44 = vadd.f32 %v1341_v1, %v568_v43 }
  0xf4   : > { %616 = vst [vmem:[%s1346_s22 + $0x28] sm:$0xff] %v600_v44  ;;  %v538_v45 = vpop.f32.mrf.mxu2 }
  0xf5   : > { %v587_v46 = vpop.f32.mrf.mxu3 }
  0xf6   : > { %v588_v47 = vadd.f32 %v587_v46, %v538_v45  ;;  %v521_v48 = vpop.f32.mrf.mxu0 }
  0xf7   : > { %v570_v49 = vpop.f32.mrf.mxu1 }
  0xf8   : > { %v608_v50 = vadd.f32 %v1341_v1, %v588_v47  ;;  %v571_v51 = vadd.f32 %v570_v49, %v521_v48 }
  0xfa   : > { %624 = vst [vmem:[%s1346_s22 + $0x68] sm:$0xff] %v608_v50  ;;  %v601_v52 = vadd.f32 %v1341_v1, %v571_v51 }
  0xfc   : > { %617 = vst [vmem:[%s1346_s22 + $0x30] sm:$0xff] %v601_v52  ;;  %v541_v53 = vpop.f32.mrf.mxu2 }
  0xfd   : > { %v590_v54 = vpop.f32.mrf.mxu3 }
  0xfe   : > { %v591_v55 = vadd.f32 %v590_v54, %v541_v53  ;;  %v523_v56 = vpop.f32.mrf.mxu0 }
  0xff   : > { %v572_v57 = vpop.f32.mrf.mxu1 }
 0x100   : > { %v609_v58 = vadd.f32 %v1341_v1, %v591_v55  ;;  %v573_v59 = vadd.f32 %v572_v57, %v523_v56 }
 0x102   : > { %625 = vst [vmem:[%s1346_s22 + $0x70] sm:$0xff] %v609_v58  ;;  %v602_v60 = vadd.f32 %v1341_v1, %v573_v59 }
 0x104   : > { %618 = vst [vmem:[%s1346_s22 + $0x38] sm:$0xff] %v602_v60  ;;  %v543_v61 = vpop.f32.mrf.mxu2 }
 0x105   : > { %v592_v62 = vpop.f32.mrf.mxu3 }
 0x106   : > { %v593_v63 = vadd.f32 %v592_v62, %v543_v61 }
 0x108   : > { %v610_v0 = vadd.f32 %v1341_v1, %v593_v63 }
 0x10a   : > { %626 = vst [vmem:[%s1346_s22 + $0x78] sm:$0xff] %v610_v0 }
 0x10b   : > { %1103 = shalt.err (!%p1100_p0)
}
 0x10c   : > { %s1169_s6 = smov 128   ;;  %s1170_s19 = smov 8  }
 0x10d   : > { %942 = dma.vmem_to_hbm [thread:$0]  (%p1270_p5), %s641_s25, 2048, %s643_s26, %s628_s15, %s1169_s6, %s1169_s6, %s1170_s19  }
 0x10e PF: > { %s657_s1 = sand.u32 1, %s1142_s12   ;;  %p953_p3 = pnand %p743_p11, %p1240_p6 }
 0x10f   : > { %s658_s20 = scalar_lea.sflag [#allocation4], %s657_s1 }
 0x110   : > { %p954_p7 = pneg %p953_p3 }
 0x112   : > { %1137 = dma.done.wait (%p954_p7), %s658_s20, 2048  }
 0x113   : > { %1139 = vsyncadd (%p954_p7), %s658_s20, 4294965248  ;;  %s20_s17 = sadd.s32 1, %s1162_s17   ;;  %s1431_s12 = smov %s1146_s13 }
 0x114   : > { %p17_p9 = scmp.ge.s32.totalorder %s20_s17, 4   ;;  %s1432_s13 = smov %s1150_s14 }
 0x115   : > { %s1433_s14 = smov %s1279_s18  ;;  %s1434_s15 = smov %s1158_s16 }
 0x116   : > { %s1435_s16 = smov %s1437_s5  ;;  %19 = sbr.rel (!%p17_p9) target bundleno = 9 (0x9), region = 86 }
 0x11b   :  { %664 = vsyncpa [#allocation3], 1 }
 0x11c   :  { %666 = vsyncpa [#allocation3 + $0x1], 1 }
 0x11d   :  { %667 = vsyncpa [#allocation6], 1 }
 0x11e   :  { %668 = vsyncpa [#allocation4], 1 }
 0x11f   :  { %670 = vsyncpa [#allocation4 + $0x1], 1 }

</bundles_post_ra>
